<compile_context>
chip_gen: v7x
topology: tpu7x:2x2x1
jax: 0.10.0
libtpu: 0.0.40
codegen_flags: <defaults>
</compile_context>

<pallas_src>
import functools

import jax
import jax.numpy as jnp
from jax import lax
from jax.experimental import pallas as pl
from jax.experimental.pallas import tpu as pltpu


def _round_up(x, m):
    return ((x + m - 1) // m) * m


def _vmem_cap_bytes():
    """Physical per-core VMEM, with a v7x-safe fallback."""
    try:
        info = pltpu.get_tpu_info()
        cap = getattr(info, "vmem_capacity_bytes", None)
        if cap:
            return int(cap)
    except Exception:
        pass
    return 64 * 1024 * 1024  # conservative: v7x per-TensorCore VMEM


# ---------------------------------------------------------------------------
# Pass 1: fused K/V projection (1x1 convs == channel matmuls)
# ---------------------------------------------------------------------------
def _kv_proj_kernel(x_ref, w_ref, b_ref, k_ref, v_ref, *, ip):
    # x_ref: (1, Tr, Cp) bf16; w_ref: (Cp, IP+Cp) bf16; b_ref: (1, IP+Cp) f32
    kv = jnp.dot(x_ref[0], w_ref[...],
                 preferred_element_type=jnp.float32) + b_ref[...]
    # lane-aligned slices (ip and Cp are multiples of 128)
    k_ref[0] = kv[:, :ip].astype(k_ref.dtype)
    v_ref[0] = kv[:, ip:].astype(v_ref.dtype)


# ---------------------------------------------------------------------------
# Pass 2: fused Q projection + flash attention + residual (gamma*attn(x) + x)
# ---------------------------------------------------------------------------
def _attn_kernel(x_ref, wq_ref, bq_ref, k_ref, v_ref, gamma_ref, o_ref,
                 q_sc, m_sc, l_sc, acc_sc, *, hw, hw_pad, tk, approx_recip):
    kv = pl.program_id(2)

    @pl.when(kv == 0)
    def _():
        # Q projection from the resident residual tile (x never leaves VMEM
        # between here and the finalize step).
        x_bf = x_ref[0].astype(jnp.bfloat16)
        q = jnp.dot(x_bf, wq_ref[...],
                    preferred_element_type=jnp.float32) + bq_ref[...]
        q_sc[...] = q.astype(q_sc.dtype)
        m_sc[...] = jnp.full_like(m_sc, -jnp.inf)
        l_sc[...] = jnp.zeros_like(l_sc)
        acc_sc[...] = jnp.zeros_like(acc_sc)

    q = q_sc[...]                                     # (tq, IP) bf16
    k = k_ref[0]                                      # (tk, IP) bf16
    # energy[i, j] = q_i . k_j  (contract shared last axis, no explicit k.T)
    s = lax.dot_general(q, k, (((1,), (1,)), ((), ())),
                        preferred_element_type=jnp.float32)   # (tq, tk) f32

    if hw_pad > hw:   # static: mask padded key positions with -inf
        col = kv * tk + lax.broadcasted_iota(jnp.int32, s.shape, 1)
        s = jnp.where(col < hw, s, -jnp.inf)

    m_prev = m_sc[...]
    m_new = jnp.maximum(m_prev, jnp.max(s, axis=-1, keepdims=True))
    alpha = jnp.exp(m_prev - m_new)
    p = jnp.exp(s - m_new)
    l_sc[...] = alpha * l_sc[...] + jnp.sum(p, axis=-1, keepdims=True)
    acc_sc[...] = alpha * acc_sc[...] + jnp.dot(
        p.astype(v_ref.dtype), v_ref[0], preferred_element_type=jnp.float32)
    m_sc[...] = m_new

    @pl.when(kv == pl.num_programs(2) - 1)
    def _():
        if approx_recip:
            inv_l = pl.reciprocal(l_sc[...], approx=True)
        else:
            inv_l = 1.0 / l_sc[...]
        attn_out = acc_sc[...] * inv_l                         # (tq, Cp) f32
        gamma = gamma_ref[0]
        o_ref[0] = (gamma * attn_out
                    + x_ref[0].astype(jnp.float32)).astype(o_ref.dtype)


# ---------------------------------------------------------------------------
# Wrapper
# ---------------------------------------------------------------------------
def nonlocal_block(x, wq, bq, wk, bk, wv, bv, gamma, *, tq=512, tk=256,
                   approx_recip=True):
    """x: (B, C, H, W) NCHW, same convention as the PyTorch module.

    tq: query-row tile (pass-2 arithmetic intensity ~ tq flops per k/v byte).
    tk: key/value tile (multiple of 256 fills the v6e/v7x MXU depth).
    """
    B, C, H, W = x.shape
    HW = H * W
    inter = wq.shape[1]

    IP = _round_up(max(inter, 1), 128)     # q/k channel dim padded to 128
    Cp = _round_up(C, 128)                 # feature dim padded (lane-dense)

    hw8 = _round_up(HW, 8)
    if hw8 <= tq:                          # small spatial: single tile
        tq_ = tk_ = hw8
    else:
        assert tq % tk == 0, "tq must be a multiple of tk"
        tq_, tk_ = tq, tk
    HW_pad = _round_up(HW, tq_)            # divisible by both tq_ and tk_
    n_q = HW_pad // tq_
    n_kv = HW_pad // tk_

    f32, bf16 = jnp.float32, jnp.bfloat16

    # channel-last, zero-padded slabs
    x_cl = jnp.transpose(x.reshape(B, C, HW), (0, 2, 1))            # (B,HW,C)
    x_p = jnp.zeros((B, HW_pad, Cp), x.dtype).at[:, :HW, :C].set(x_cl)
    x_bf = x_p.astype(bf16)                # bf16 copy: pass-1 matmul input

    # fused, zero-padded, pre-cast [Wk | Wv] (zero padding keeps q.k^T and v
    # exact: padded q/k columns and padded v channels are identically 0)
    w_kv = jnp.zeros((Cp, IP + Cp), bf16)
    w_kv = w_kv.at[:C, :inter].set(wk.astype(bf16))
    w_kv = w_kv.at[:C, IP:IP + C].set(wv.astype(bf16))
    b_kv = jnp.zeros((1, IP + Cp), f32)
    b_kv = b_kv.at[:, :inter].set(bk.astype(f32))
    b_kv = b_kv.at[:, IP:IP + C].set(bv.astype(f32))

    wq_p = jnp.zeros((Cp, IP), bf16).at[:C, :inter].set(wq.astype(bf16))
    bq_p = jnp.zeros((1, IP), f32).at[:, :inter].set(bq.astype(f32))

    # device-aware scoped-VMEM budget (<=75% of per-core VMEM; v7x-safe)
    cap = _vmem_cap_bytes()
    vmem_ceiling = (cap // 4) * 3
    itemsize = jnp.dtype(x.dtype).itemsize

    # ---- pass 1: fused K/V projection ----
    est1 = (2 * tq_ * Cp * 2                     # x bf16 in (double-buffered)
            + 2 * tq_ * (IP + Cp) * 2            # k/v bf16 out (double-buffered)
            + 2 * Cp * (IP + Cp) * 2             # resident fused weights
            + 2 * tq_ * (IP + Cp) * 4)           # f32 matmul intermediates
    vmem1 = int(min(max(2 * est1, 32 * 1024 * 1024), vmem_ceiling))

    k_arr, v_arr = pl.pallas_call(
        functools.partial(_kv_proj_kernel, ip=IP),
        out_shape=(jax.ShapeDtypeStruct((B, HW_pad, IP), bf16),
                   jax.ShapeDtypeStruct((B, HW_pad, Cp), bf16)),
        grid_spec=pltpu.PrefetchScalarGridSpec(
            num_scalar_prefetch=0,
            grid=(B, n_q),
            in_specs=[
                pl.BlockSpec((1, tq_, Cp), lambda b, r: (b, r, 0)),       # x (bf16)
                pl.BlockSpec((Cp, IP + Cp), lambda b, r: (0, 0)),         # [Wk|Wv]
                pl.BlockSpec((1, IP + Cp), lambda b, r: (0, 0)),          # [bk|bv]
            ],
            out_specs=[
                pl.BlockSpec((1, tq_, IP), lambda b, r: (b, r, 0)),       # k
                pl.BlockSpec((1, tq_, Cp), lambda b, r: (b, r, 0)),       # v
            ]),
        compiler_params=pltpu.CompilerParams(
            dimension_semantics=("parallel", "parallel"),
            vmem_limit_bytes=vmem1),
    )(x_bf, w_kv, b_kv)

    # ---- pass 2: fused Q projection + flash attention + residual ----
    est2 = (4 * tq_ * Cp * itemsize              # x residual in + out (dbl-buf)
            + 2 * tk_ * (IP + Cp) * 2            # k/v bf16 (double-buffered)
            + Cp * IP * 2 + 2 * IP * 4           # Wq + bq (resident)
            + tq_ * IP * 2                       # q scratch (bf16)
            + tq_ * Cp * 4 + 2 * tq_ * 4         # acc + m/l scratch
            + 6 * tq_ * tk_ * 4)                 # s/p softmax temporaries
    vmem2 = int(min(max(2 * est2, 32 * 1024 * 1024), vmem_ceiling))

    out_p = pl.pallas_call(
        functools.partial(_attn_kernel, hw=HW, hw_pad=HW_pad, tk=tk_,
                          approx_recip=approx_recip),
        out_shape=jax.ShapeDtypeStruct((B, HW_pad, Cp), x.dtype),
        grid_spec=pltpu.PrefetchScalarGridSpec(
            num_scalar_prefetch=0,
            grid=(B, n_q, n_kv),
            in_specs=[
                pl.BlockSpec((1, tq_, Cp), lambda b, qi, ki: (b, qi, 0)),  # x (residual + Q src)
                pl.BlockSpec((Cp, IP), lambda b, qi, ki: (0, 0)),          # Wq
                pl.BlockSpec((1, IP), lambda b, qi, ki: (0, 0)),           # bq
                pl.BlockSpec((1, tk_, IP), lambda b, qi, ki: (b, ki, 0)),  # k
                pl.BlockSpec((1, tk_, Cp), lambda b, qi, ki: (b, ki, 0)),  # v
                pl.BlockSpec(memory_space=pltpu.MemorySpace.SMEM),         # gamma
            ],
            out_specs=pl.BlockSpec((1, tq_, Cp), lambda b, qi, ki: (b, qi, 0)),
            scratch_shapes=[
                pltpu.VMEM((tq_, IP), bf16),         # q tile (built at kv==0)
                pltpu.VMEM((tq_, 1), jnp.float32),   # running max m
                pltpu.VMEM((tq_, 1), jnp.float32),   # running denom l
                pltpu.VMEM((tq_, Cp), jnp.float32),  # output accumulator
            ]),
        compiler_params=pltpu.CompilerParams(
            dimension_semantics=("parallel", "parallel", "arbitrary"),
            vmem_limit_bytes=vmem2),
    )(x_p, wq_p, bq_p, k_arr, v_arr, gamma)

    out = out_p[:, :HW, :C]                                       # (B, HW, C)
    return jnp.transpose(out, (0, 2, 1)).reshape(B, C, H, W)


def nonlocal_block_ref(x, wq, bq, wk, bk, wv, bv, gamma):
    """Pure-JAX f32 reference mirroring the PyTorch forward exactly."""
    B, C, H, W = x.shape
    HW = H * W
    x_cl = jnp.transpose(x.reshape(B, C, HW), (0, 2, 1)).astype(jnp.float32)
    q = x_cl @ wq + bq                      # (B, HW, Ci)
    k = x_cl @ wk + bk                      # (B, HW, Ci)
    v = x_cl @ wv + bv                      # (B, HW, C)
    energy = jnp.einsum("bid,bjd->bij", q, k)
    attn = jax.nn.softmax(energy, axis=-1)
    out = jnp.einsum("bij,bjc->bic", attn, v)
    out = gamma[0] * out + x_cl
    return jnp.transpose(out, (0, 2, 1)).reshape(B, C, H, W).astype(x.dtype)


if __name__ == "__main__":
    # Module config: planes must be divisible by reduce_ratio=8.
    planes = 32
    reduce_ratio = 8
    inter = planes // reduce_ratio
    B, H, W = 2, 12, 12                     # HW = 144 (not a tile multiple)

    key = jax.random.PRNGKey(0)
    kx, kq, kbq, kk, kbk, kv_, kbv = jax.random.split(key, 7)

    x = jax.random.normal(kx, (B, planes, H, W), dtype=jnp.float32)

    # Conv2d 1x1 weights stored as (in, out) matrices.
    wq = jax.random.normal(kq, (planes, inter), dtype=jnp.float32) * 0.1
    bq = jax.random.normal(kbq, (1, inter), dtype=jnp.float32) * 0.1
    wk = jax.random.normal(kk, (planes, inter), dtype=jnp.float32) * 0.1
    bk = jax.random.normal(kbk, (1, inter), dtype=jnp.float32) * 0.1
    wv = jax.random.normal(kv_, (planes, planes), dtype=jnp.float32) * 0.1
    bv = jax.random.normal(kbv, (1, planes), dtype=jnp.float32) * 0.1
    # nn.Parameter(torch.zeros(1)) -> gamma=0 would make output trivially == x;
    # use a nonzero deterministic value so the attention path is exercised.
    gamma = jnp.array([0.5], dtype=jnp.float32)

    # Small explicit tiles so this tiny test exercises multiple q tiles,
    # multiple kv tiles, -inf key masking and a fully-padded kv tile.
    out = nonlocal_block(x, wq, bq, wk, bk, wv, bv, gamma, tq=128, tk=64)
    out = jax.block_until_ready(out)

    ref = nonlocal_block_ref(x, wq, bq, wk, bk, wv, bv, gamma)
    assert out.shape == x.shape and out.dtype == x.dtype
    # bf16 MXU path vs pure-f32 reference: tolerance loosened accordingly
    # (the residual x is added in exact f32; only gamma*attn is mixed precision).
    err = float(jnp.max(jnp.abs(out - ref)))
    assert jnp.allclose(out, ref, atol=2e-2, rtol=2e-2), err

    print("KERNEL_OK")
</pallas_src>

<mosaic_0001>
module attributes {stable_mosaic.version = 11 : i64} {
  func.func @_kv_proj_kernel(%arg0: i32, %arg1: i32, %arg2: memref<1x128x128xbf16, #tpu.memory_space<vmem>>, %arg3: memref<128x256xbf16, #tpu.memory_space<vmem>>, %arg4: memref<1x256xf32, #tpu.memory_space<vmem>>, %arg5: memref<1x128x128xbf16, #tpu.memory_space<vmem>>, %arg6: memref<1x128x128xbf16, #tpu.memory_space<vmem>>) attributes {dimension_semantics = [#tpu.dimension_semantics<parallel>, #tpu.dimension_semantics<parallel>], iteration_bounds = array<i64: 2, 2>, scalar_prefetch = 0 : i64, scratch_operands = 0 : i64, tpu.core_type = #tpu.core_type<tc>, window_params = [{transform_indices = @transform_0, window_bounds = array<i64: 1, 128, 128>}, {pipeline_mode = #tpu.pipeline_mode<synchronous>, transform_indices = @transform_1, window_bounds = array<i64: 128, 256>}, {pipeline_mode = #tpu.pipeline_mode<synchronous>, transform_indices = @transform_2, window_bounds = array<i64: 1, 256>}, {transform_indices = @transform_3, window_bounds = array<i64: 1, 128, 128>}, {transform_indices = @transform_4, window_bounds = array<i64: 1, 128, 128>}]} {
    %c0 = arith.constant 0 : index
    %c0_0 = arith.constant 0 : index
    %c0_1 = arith.constant 0 : index
    %0 = vector.load %arg2[%c0, %c0_0, %c0_1] : memref<1x128x128xbf16, #tpu.memory_space<vmem>>, vector<1x128x128xbf16>
    %1 = vector.shape_cast %0 : vector<1x128x128xbf16> to vector<128x128xbf16>
    %c0_2 = arith.constant 0 : index
    %c0_3 = arith.constant 0 : index
    %2 = vector.load %arg3[%c0_2, %c0_3] : memref<128x256xbf16, #tpu.memory_space<vmem>>, vector<128x256xbf16>
    %cst = arith.constant dense<0.000000e+00> : vector<128x256xf32>
    %3 = tpu.matmul %1, %2, %cst {dimension_numbers = #tpu.dot_dimension_numbers<[1], [0], [0], [1], [0, 0, 1, 1], [], []>} : vector<128x128xbf16>, vector<128x256xbf16>, vector<128x256xf32> -> vector<128x256xf32>
    %c0_4 = arith.constant 0 : index
    %c0_5 = arith.constant 0 : index
    %4 = vector.load %arg4[%c0_4, %c0_5] : memref<1x256xf32, #tpu.memory_space<vmem>>, vector<1x256xf32>
    %5 = vector.broadcast %4 : vector<1x256xf32> to vector<128x256xf32>
    %6 = arith.addf %3, %5 : vector<128x256xf32>
    %7 = vector.extract_strided_slice %6 {offsets = [0, 0], sizes = [128, 128], strides = [1, 1]} : vector<128x256xf32> to vector<128x128xf32>
    %8 = arith.truncf %7 : vector<128x128xf32> to vector<128x128xbf16>
    %c0_6 = arith.constant 0 : index
    %c0_7 = arith.constant 0 : index
    %c0_8 = arith.constant 0 : index
    %9 = vector.load %arg5[%c0_6, %c0_7, %c0_8] : memref<1x128x128xbf16, #tpu.memory_space<vmem>>, vector<1x128x128xbf16>
    %10 = vector.shape_cast %9 : vector<1x128x128xbf16> to vector<128x128xbf16>
    %11 = vector.shape_cast %8 : vector<128x128xbf16> to vector<1x128x128xbf16>
    tpu.vector_store %arg5[%c0_6, %c0_7, %c0_8], %11 {strides = array<i32>} : memref<1x128x128xbf16, #tpu.memory_space<vmem>>, vector<1x128x128xbf16>,
    %12 = vector.extract_strided_slice %6 {offsets = [0, 128], sizes = [128, 128], strides = [1, 1]} : vector<128x256xf32> to vector<128x128xf32>
    %13 = arith.truncf %12 : vector<128x128xf32> to vector<128x128xbf16>
    %c0_9 = arith.constant 0 : index
    %c0_10 = arith.constant 0 : index
    %c0_11 = arith.constant 0 : index
    %14 = vector.load %arg6[%c0_9, %c0_10, %c0_11] : memref<1x128x128xbf16, #tpu.memory_space<vmem>>, vector<1x128x128xbf16>
    %15 = vector.shape_cast %14 : vector<1x128x128xbf16> to vector<128x128xbf16>
    %16 = vector.shape_cast %13 : vector<128x128xbf16> to vector<1x128x128xbf16>
    tpu.vector_store %arg6[%c0_9, %c0_10, %c0_11], %16 {strides = array<i32>} : memref<1x128x128xbf16, #tpu.memory_space<vmem>>, vector<1x128x128xbf16>,
    return
  }
  func.func @transform_0(%arg0: i32, %arg1: i32) -> (i32, i32, i32) {
    %c0_i32 = arith.constant 0 : i32
    %c0_i32_0 = arith.constant 0 : i32
    return %arg0, %arg1, %c0_i32 : i32, i32, i32
  }
  func.func @transform_1(%arg0: i32, %arg1: i32) -> (i32, i32) {
    %c0_i32 = arith.constant 0 : i32
    %c0_i32_0 = arith.constant 0 : i32
    %c0_i32_1 = arith.constant 0 : i32
    return %c0_i32, %c0_i32_0 : i32, i32
  }
  func.func @transform_2(%arg0: i32, %arg1: i32) -> (i32, i32) {
    %c0_i32 = arith.constant 0 : i32
    %c0_i32_0 = arith.constant 0 : i32
    %c0_i32_1 = arith.constant 0 : i32
    return %c0_i32, %c0_i32_0 : i32, i32
  }
  func.func @transform_3(%arg0: i32, %arg1: i32) -> (i32, i32, i32) {
    %c0_i32 = arith.constant 0 : i32
    %c0_i32_0 = arith.constant 0 : i32
    return %arg0, %arg1, %c0_i32 : i32, i32, i32
  }
  func.func @transform_4(%arg0: i32, %arg1: i32) -> (i32, i32, i32) {
    %c0_i32 = arith.constant 0 : i32
    %c0_i32_0 = arith.constant 0 : i32
    return %arg0, %arg1, %c0_i32 : i32, i32, i32
  }
}

</mosaic_0001>

<bundles_post_ra>
// kernel: tpu_custom_call.1
= control target key start
LH: loop header
LB: loop body
LE: loop exit
PB: predicated region body
PF: predicated region fallthrough
CT: control target
= control target key end

     0   :  { %s1837_s0 = inlined_call_operand.hbm [shape: bf16[2,256,128], index: 0, kind: input, shape index: {}]   ;;  %s1838_s1 = inlined_call_operand.hbm [shape: bf16[128,256], index: 1, kind: input, shape index: {}]   ;;  %s1839_s2 = inlined_call_operand.vmem [shape: f32[1,256], index: 2, kind: input, shape index: {}]   ;;  %s1840_s3 = inlined_call_operand.hbm [shape: bf16[2,256,128], index: 3, kind: output, shape index: {0}]   ;;  %s1841_s4 = inlined_call_operand.hbm [shape: bf16[2,256,128], index: 4, kind: output, shape index: {1}]  }
   0x1   :  { %1851 = sst [smem:[#allocation19_spill]] %s1838_s1 }
   0x2   :  { %10 = vsyncpa [#allocation3], 0 }
   0x3   :  { %12 = vsyncpa [#allocation3 + $0x1], 0 }
   0x4   :  { %13 = vsyncpa [#allocation6], 0 }
   0x5   :  { %14 = vsyncpa [#allocation4], 0 }
   0x6   :  { %16 = vsyncpa [#allocation4 + $0x1], 0 }
   0x7   :  { %17 = vsyncpa [#allocation9], 0 }
   0x8   :  { %19 = vsyncpa [#allocation9 + $0x1], 0  ;;  %s1470_s15 = smov 0   ;;  %s1472_s16 = smov 0  }
   0x9   :  { %s1474_s17 = smov 0   ;;  %s1476_s18 = smov 0  }
   0xa   :  { %s1478_s19 = smov 0   ;;  %s1480_s20 = smov 0  }
   0xb   :  { %s1482_s21 = smov 0   ;;  %s1484_s22 = smov 0  }
   0xc LB: > { %1852 = sst [smem:[#allocation14_spill]] %s1404_s15  ;;  %s885_s23 = sadd.s32 4294967295, %s1432_s22   ;;  %s1432_s22 = sphi %s1484_s22, %s25_s22   ;;  %s1428_s21 = sphi %s1482_s21, %s1881_s21   ;;  %s1424_s20 = sphi %s1480_s20, %s1875_s20   ;;  %s1420_s19 = sphi %s1478_s19, %s1880_s19   ;;  %s1416_s18 = sphi %s1476_s18, %s1874_s18   ;;  %s1412_s17 = sphi %s1474_s17, %s1879_s17   ;;  %s1408_s16 = sphi %s1472_s16, %s1878_s16   ;;  %s1404_s15 = sphi %s1470_s15, %s1877_s15  }
   0xd   : > { %1853 = sst [smem:[#allocation15_spill]] %s1424_s20  ;;  %s886_s24 = sadd.s32 4294967294, %s1432_s22  }
   0xe   : > { %p59_p0 = scmp.ne.s32.totalorder %s1408_s16, %s1404_s15  ;;  %p1514_p1 = scmp.eq.s32.totalorder %s885_s23, 0 }
   0xf   : > { %p1518_p2 = scmp.eq.s32.totalorder %s885_s23, 3  ;;  %p133_p3 = scmp.eq.s32.totalorder %s886_s24, 3 }
  0x10   : > { %s1854_s25 = scalar_select %p1514_p1, 1, 0 }
  0x11   : > { %s1855_s26 = scalar_select %p1518_p2, 1, 0 }
  0x12   : > { %p1524_p4 = por %p1514_p1, %p59_p0  ;;  %p887_p5 = scmp.ge.s32.totalorder %s1432_s22, 1 }
  0x13   : > { %p1529_p6 = por %p133_p3, %p59_p0  ;;  %p168_p7 = scmp.lt.s32.totalorder %s1432_s22, 5 }
  0x14   : > { %s1856_s27 = scalar_select %p1524_p4, 1, 0 }
  0x15   : > { %s1857_s28 = scalar_select %p1529_p6, 1, 0 }
  0x16   : > { %p1534_p8 = pnand %p887_p5, %p168_p7  ;;  %s1434_s30 = smov [#allocation5]  }
  0x17   : > { %1858 = sst [smem:[#allocation16_spill]] %s1857_s28  ;;  %s180_s5 = sshll.u32 %s1434_s30, 4  ;;  %s181_s5 = int_to_ptr.vmem [resolvable:$true] %s180_s5 }
  0x18   : > { %s1859_s29 = scalar_select %p1534_p8, 1, 0 }
  0x19   : > { %p1117_p9 = pneg %p1534_p8  ;;  %s1861_s1 = sld [smem:[#allocation19_spill]] }
  0x1b   : > { %p1542_p10 = pnand %p1117_p9, %p1514_p1 }
  0x1d   : > { %p1242_p12 = pneg %p1542_p10 }
  0x1f   : > { %s1240_s9 = scalar_lea.hbm %s1861_s1, 2048 }
  0x20   : > { %p1241_p11 = scmp.ne.s32.totalorder %s1861_s1, %s1240_s9  ;;  %p1247_p3 = scmp.lt.u32.totalorder %s1240_s9, %s1861_s1 }
  0x22   : > { %p1243_p13 = pnand %p1242_p12, %p1241_p11 }
  0x24   : > { %p1244_p0 = pneg %p1243_p13 }
  0x26   : > { %p1249_p5 = pnand %p1247_p3, %p1244_p0 }
  0x28   : > { %1252 = shalt.err (!%p1249_p5)
}
  0x29   : > { %s1253_s14 = scalar_lea.vmem %s181_s5, 2048  ;;  %p1261_p1 = scmp.lt.s32.totalorder %s181_s5, %s181_s5 }
  0x2a   : > { %p1254_p7 = scmp.ne.s32.totalorder %s181_s5, %s1253_s14  ;;  %p1262_p4 = scmp.lt.s32.totalorder %s1253_s14, %s1253_s14 }
  0x2c   : > { %p1256_p9 = pnand %p1254_p7, %p1242_p12  ;;  %p1263_p8 = por %p1262_p4, %p1261_p1 }
  0x2e   : > { %p1257_p6 = pneg %p1256_p9 }
  0x30   : > { %p1264_p2 = pnand %p1263_p8, %p1257_p6 }
  0x32   : > { %1267 = shalt.err (!%p1264_p2)
}
  0x33   : > { %s1435_s23 = smov 128   ;;  %s1436_s24 = smov 8  }
  0x34   : > { %1120 = dma.hbm_to_vmem [thread:$0]  (!%p1542_p10), %s1861_s1, 2048, %s181_s5, [#allocation6], %s1435_s23, %s1435_s23, %s1436_s24  }
  0x35   : > { %s34_s8 = sadd.s32 1, %s1424_s20  ;;  %s37_s9 = sadd.s32 1, %s1428_s21 }
  0x36   : > { %p35_p1 = scmp.ge.s32.totalorder %s34_s8, 2  ;;  %s46_s10 = sadd.s32 1, %s1412_s17 }
  0x37   : > { %p53_p2 = scmp.ne.s32.totalorder %s1412_s17, %s1408_s16  ;;  %p54_p4 = scmp.eq.s32.totalorder %s1432_s22, 0 }
  0x38   : > { %s1883_s8 = smov (%p35_p1, %s34_s8), 0  ;;  %s1885_s9 = smov (!%p35_p1, %s37_s9), %s1428_s21 }
  0x39   : > { %1862 = sst [smem:[#allocation17_spill]] %s1883_s8  ;;  %s42_s11 = ssub.s32 %s1424_s20, %s1883_s8 }
  0x3a   : > { %p39_p6 = scmp.ge.s32.totalorder %s1885_s9, 2  ;;  %p1863_p8 = scmp.ne.s32.totalorder %s1855_s26, 0 }
  0x3b   : > { %p1579_p10 = por %p54_p4, %p53_p2  ;;  %p1133_p12 = scmp.lt.s32.totalorder %s1432_s22, 4 }
  0x3c   : > { %p1575_p11 = por %p1863_p8, %p53_p2  ;;  %s1887_s9 = smov (%p39_p6, %s1885_s9), 0 }
  0x3d   : > { %1866 = sst [smem:[#allocation18_spill]] %s1887_s9  ;;  %s197_s12 = sand.u32 1, %s1412_s17  }
  0x3e   : > { %s891_s13 = sshll.u32 %s1424_s20, 4  ;;  %s41_s14 = ssub.s32 %s1428_s21, %s1887_s9 }
  0x3f   : > { %s43_s23 = sor.u32 %s42_s11, %s41_s14  ;;  %s890_s24 = sshll.u32 %s197_s12, 6 }
  0x40   : > { %p44_p13 = scmp.eq.s32.totalorder %s43_s23, 0  ;;  %s892_s26 = sshll.u32 %s1428_s21, 5 }
  0x41   : > { %s201_s30 = scalar_lea.vmem [#allocation2], %s890_s24  ;;  %s207_s8 = sadd.s32 %s892_s26, %s891_s13 }
  0x42   : > { %s210_s7 = sshll.u32 %s201_s30, 4  ;;  %s893_s28 = sshll.u32 %s207_s8, 6  ;;  %s1594_s7 = int_to_ptr.vmem [resolvable:$true] %s210_s7 }
  0x43   : > { %s1592_s1 = scalar_select %p44_p13, %s1412_s17, %s46_s10  }
  0x44   : > { %p1600_p0 = pnand %p1133_p12, %p1579_p10  ;;  %s1607_s11 = scalar_lea.hbm %s1837_s0, %s893_s28 }
  0x45   : > { %s1609_s10 = scalar_lea.sflag [#allocation3], %s197_s12  ;;  %s1268_s8 = scalar_lea.hbm %s1607_s11, 1024 }
  0x46   : > { %p1269_p3 = scmp.ne.s32.totalorder %s1607_s11, %s1268_s8  ;;  %p1270_p5 = pneg %p1600_p0 }
  0x47   : > { %s1273_s9 = scalar_lea.hbm %s1837_s0, 4096  ;;  %p1274_p1 = scmp.lt.u32.totalorder %s1607_s11, %s1837_s0 }
  0x48   : > { %p1271_p7 = pnand %p1270_p5, %p1269_p3  ;;  %p1275_p2 = scmp.lt.u32.totalorder %s1273_s9, %s1268_s8 }
  0x49   : > { %p1277_p6 = scmp.lt.u32.totalorder %s1268_s8, %s1607_s11 }
  0x4a   : > { %p1272_p9 = pneg %p1271_p7  ;;  %p1276_p4 = por %p1275_p2, %p1274_p1 }
  0x4c   : > { %p1278_p8 = por %p1277_p6, %p1276_p4 }
  0x4e   : > { %p1279_p10 = pnand %p1278_p8, %p1272_p9 }
  0x50   : > { %1282 = shalt.err (!%p1279_p10)
}
  0x51   : > { %s1283_s12 = scalar_lea.vmem %s1594_s7, 1024  ;;  %s1437_s14 = smov [#allocation2]  }
  0x52   : > { %p1284_p12 = scmp.ne.s32.totalorder %s1594_s7, %s1283_s12  ;;  %s1288_s23 = sshll.u32 %s1437_s14, 4  ;;  %s1289_s23 = int_to_ptr.vmem [resolvable:$false] %s1288_s23 }
  0x53   : > { %s1290_s24 = scalar_lea.vmem %s1289_s23, 2048  ;;  %p1291_p7 = scmp.lt.s32.totalorder %s1594_s7, %s1289_s23 }
  0x54   : > { %p1286_p13 = pnand %p1284_p12, %p1270_p5  ;;  %p1292_p1 = scmp.lt.s32.totalorder %s1290_s24, %s1283_s12 }
  0x56   : > { %p1287_p3 = pneg %p1286_p13  ;;  %p1293_p2 = por %p1292_p1, %p1291_p7 }
  0x58   : > { %p1294_p4 = pnand %p1293_p2, %p1287_p3 }
  0x5a   : > { %1297 = shalt.err (!%p1294_p4)
}
  0x5b   : > { %s1438_s26 = smov 64   ;;  %s1439_s30 = smov 4  }
  0x5c   : > { %1124 = dma.hbm_to_vmem [thread:$0]  (!%p1600_p0), %s1607_s11, 1024, %s1594_s7, %s1609_s10, %s1438_s26, %s1438_s26, %s1439_s30  }
  0x5d   : > { %p1868_p5 = scmp.ne.s32.totalorder %s1859_s29, 0 }
  0x5e   : > { %s1640_s8 = sand.u32 (!%p1868_p5), 1, %s1408_s16   ;;  %p1869_p9 = scmp.ne.s32.totalorder (!%p1868_p5), %s1856_s27, 0 }
  0x5f   : > { %222 = sbr.rel (%p1868_p5) target bundleno = 421 (0x1a5), region = 32  ;;  %s1643_s5 = sshll.u32 (!%p1868_p5), %s1640_s8, 6 }
  0x60   : > { %s225_s20 = scalar_lea.sflag (!%p1868_p5), [#allocation3], %s1640_s8  ;;  %s1647_s9 = scalar_lea.vmem (!%p1868_p5), [#allocation2], %s1643_s5 }
  0x66   : > { %1387 = dma.done.wait (%p1869_p9), %s225_s20, 1024  }
  0x67   : > { %1389 = vsyncadd (%p1869_p9), %s225_s20, 4294966272  ;;  %p1870_p0 = scmp.ne.s32.totalorder %s1854_s25, 0 }
  0x69   : > { %1391 = dma.done.wait (%p1870_p0), [#allocation6], 2048  }
  0x6a   : > { %1393 = vsyncadd (%p1870_p0), [#allocation6], 4294965248  ;;  %v1440_v0 = vmov 0   ;;  %v1208_v1 = vld [vmem:[#allocation5 + $0x4] ss:$8 sps:$4 sm:$0xff]   ;;  %v1236_v21 = vld [vmem:[%s1647_s9 + $0x10] sm:$0xff]   ;;  %v300_v25 = vlaneseq }
  0x6b   : > { %470 = vmatprep.mubr.bf16.mxu0 %v1440_v0  ;;  %510 = vmatprep.mubr.bf16.mxu1 %v1440_v0  ;;  %v1210_v2 = vld [vmem:[#allocation5] ss:$8 sps:$4 sm:$0xff]   ;;  %v1211_v3 = vld [vmem:[#allocation5 + $0x14] ss:$8 sps:$4 sm:$0xff]   ;;  %v1213_v4 = vld [vmem:[#allocation5 + $0x10] ss:$8 sps:$4 sm:$0xff]  }
  0x6c   : > { %438 = vmatprep.subr.bf16.mxu0 %v1208_v1  ;;  %1091 = vmatprep.subr.bf16.mxu1 %v1208_v1  ;;  %v1214_v5 = vld [vmem:[#allocation5 + $0x24] ss:$8 sps:$4 sm:$0xff]   ;;  %v1216_v6 = vld [vmem:[#allocation5 + $0x20] ss:$8 sps:$4 sm:$0xff]   ;;  %v1217_v7 = vld [vmem:[#allocation5 + $0x34] ss:$8 sps:$4 sm:$0xff]  }
  0x6d   : > { %439 = vmatpush1.bf16.msra.mxu0 %v1210_v2  ;;  %1099 = vmatpush1.bf16.msra.mxu1 %v1210_v2  ;;  %v1219_v8 = vld [vmem:[#allocation5 + $0x30] ss:$8 sps:$4 sm:$0xff]   ;;  %v1220_v9 = vld [vmem:[#allocation5 + $0x44] ss:$8 sps:$4 sm:$0xff]   ;;  %v1222_v10 = vld [vmem:[#allocation5 + $0x40] ss:$8 sps:$4 sm:$0xff]  }
  0x6e   : > { %440 = vmatprep.subr.bf16.mxu0 %v1211_v3  ;;  %1092 = vmatprep.subr.bf16.mxu1 %v1211_v3  ;;  %v1223_v11 = vld [vmem:[#allocation5 + $0x54] ss:$8 sps:$4 sm:$0xff]   ;;  %v1225_v12 = vld [vmem:[#allocation5 + $0x50] ss:$8 sps:$4 sm:$0xff]   ;;  %v1226_v13 = vld [vmem:[#allocation5 + $0x64] ss:$8 sps:$4 sm:$0xff]  }
  0x6f   : > { %v1228_v14 = vld [vmem:[#allocation5 + $0x60] ss:$8 sps:$4 sm:$0xff]   ;;  %v1229_v15 = vld [vmem:[#allocation5 + $0x74] ss:$8 sps:$4 sm:$0xff]   ;;  %v1231_v16 = vld [vmem:[#allocation5 + $0x70] ss:$8 sps:$4 sm:$0xff]  }
  0x70   : > { %v1232_v17 = vld [vmem:[%s1647_s9] sm:$0xff]   ;;  %v1234_v19 = vld [vmem:[%s1647_s9 + $0x8] sm:$0xff]   ;;  %v1237_v22 = vld [vmem:[%s1647_s9 + $0x30] sm:$0xff]   ;;  %v301_v26 = vshrl.u32 %v300_v25, 7  ;;  %s1689_s27 = scalar_lea.vmem [#allocation7], %s1643_s5  ;;  %s1694_s29 = scalar_lea.vmem [#allocation8], %s1643_s5 }
  0x71   : > { %441 = vmatpush1.bf16.msra.mxu0 %v1213_v4  ;;  %1100 = vmatpush1.bf16.msra.mxu1 %v1213_v4  ;;  %v1233_v18 = vld [vmem:[%s1647_s9 + $0x20] sm:$0xff]   ;;  %v1235_v20 = vld [vmem:[%s1647_s9 + $0x28] sm:$0xff]   ;;  %v1238_v23 = vld [vmem:[%s1647_s9 + $0x18] sm:$0xff]   ;;  %s957_s7 = sshll.u32 %s1416_s18, 4  ;;  %s958_s11 = sshll.u32 %s1420_s19, 5 }
  0x72   : > { %442 = vmatprep.subr.bf16.mxu0 %v1214_v5  ;;  %1093 = vmatprep.subr.bf16.mxu1 %v1214_v5  ;;  %v1239_v24 = vld [vmem:[%s1647_s9 + $0x38] sm:$0xff]   ;;  %v302_v27 = vsub.s32 0, %v301_v26  ;;  %v298_v28 = vld [vmem:[%s1839_s2] sm:$0x3]  ;;  %v306_v29 = vsub.s32 1, %v301_v26  ;;  %s1720_s10 = sadd.s32 %s958_s11, %s957_s7  ;;  %s732_s18 = sshll.u32 %s1689_s27, 4  ;;  %s1729_s18 = int_to_ptr.vmem [resolvable:$true] %s732_s18 }
  0x73   : > { %s750_s28 = sshll.u32 %s1694_s29, 4  ;;  %s959_s19 = sshll.u32 %s1720_s10, 6  ;;  %s1731_s28 = int_to_ptr.vmem [resolvable:$true] %s750_s28 }
  0x74   : > { %v1676_v30 = vrot.slane %v298_v28, %v302_v27  ;;  %v1678_v33 = vrot.slane %v298_v28, %v306_v29  ;;  %s1744_s14 = scalar_lea.hbm %s1840_s3, %s959_s19  ;;  %s1749_s26 = scalar_lea.hbm %s1841_s4, %s959_s19 }
  0x75   : > { %443 = vmatpush1.bf16.msra.mxu0 %v1216_v6  ;;  %1101 = vmatpush1.bf16.msra.mxu1 %v1216_v6  ;;  %s712_s30 = scalar_lea.sflag [#allocation4], %s1640_s8  ;;  %s1298_s5 = scalar_lea.vmem %s1729_s18, 1024 }
  0x76   : > { %444 = vmatprep.subr.bf16.mxu0 %v1217_v7  ;;  %1094 = vmatprep.subr.bf16.mxu1 %v1217_v7  ;;  %p1299_p6 = scmp.ne.s32.totalorder %s1729_s18, %s1298_s5  ;;  %s1441_s20 = smov [#allocation7]  }
  0x77   : > { %s1302_s9 = sshll.u32 %s1441_s20, 4  ;;  %s1303_s9 = int_to_ptr.vmem [resolvable:$false] %s1302_s9 }
  0x78   : > { %p1300_p8 = pnand %p1299_p6, %p1575_p11  ;;  %s1304_s15 = scalar_lea.vmem %s1303_s9, 2048 }
  0x79   : > { %445 = vmatpush1.bf16.msra.mxu0 %v1219_v8  ;;  %1102 = vmatpush1.bf16.msra.mxu1 %v1219_v8  ;;  %p1305_p12 = scmp.lt.s32.totalorder %s1729_s18, %s1303_s9  ;;  %p1306_p13 = scmp.lt.s32.totalorder %s1304_s15, %s1298_s5 }
  0x7a   : > { %446 = vmatprep.subr.bf16.mxu0 %v1220_v9  ;;  %1095 = vmatprep.subr.bf16.mxu1 %v1220_v9  ;;  %p1301_p10 = pneg %p1300_p8 }
  0x7b   : > { %p1307_p3 = por %p1306_p13, %p1305_p12 }
  0x7d   : > { %447 = vmatpush1.bf16.msra.mxu0 %v1222_v10  ;;  %1103 = vmatpush1.bf16.msra.mxu1 %v1222_v10  ;;  %p1308_p7 = pnand %p1307_p3, %p1301_p10 }
  0x7e   : > { %448 = vmatprep.subr.bf16.mxu0 %v1223_v11  ;;  %1096 = vmatprep.subr.bf16.mxu1 %v1223_v11 }
  0x81   : > { %449 = vmatpush1.bf16.msra.mxu0 %v1225_v12  ;;  %1104 = vmatpush1.bf16.msra.mxu1 %v1225_v12 }
  0x82   : > { %450 = vmatprep.subr.bf16.mxu0 %v1226_v13  ;;  %1097 = vmatprep.subr.bf16.mxu1 %v1226_v13 }
  0x85   : > { %451 = vmatpush1.bf16.msra.mxu0 %v1228_v14  ;;  %1105 = vmatpush1.bf16.msra.mxu1 %v1228_v14 }
  0x86   : > { %452 = vmatprep.subr.bf16.mxu0 %v1229_v15  ;;  %1098 = vmatprep.subr.bf16.mxu1 %v1229_v15 }
  0x89   : > { %453 = vmatpush1.bf16.msra.mxu0 %v1231_v16  ;;  %1106 = vmatpush1.bf16.msra.mxu1 %v1231_v16 }
  0x8c   : > { %471 = vmatmul.mubr.bf16.vlgmr.msra.gmra.mrb[0].mxu0 %v1232_v17  ;;  %511 = vmatmul.mubr.bf16.vlgmr.msra.gmra.mrb[0].mxu1 %v1233_v18 }
  0x8d   : > { %480 = vmatprep.mubr.bf16.mxu0 %v1440_v0  ;;  %520 = vmatprep.mubr.bf16.mxu1 %v1440_v0 }
  0x94   : > { %481 = vmatmul.mubr.bf16.gmra.mrb[4].mxu0 %v1234_v19  ;;  %521 = vmatmul.mubr.bf16.gmra.mrb[4].mxu1 %v1235_v20 }
  0x95   : > { %490 = vmatprep.mubr.bf16.mxu0 %v1440_v0  ;;  %530 = vmatprep.mubr.bf16.mxu1 %v1440_v0 }
  0x9c   : > { %491 = vmatmul.mubr.bf16.gmra.mrb[8].mxu0 %v1236_v21  ;;  %531 = vmatmul.mubr.bf16.gmra.mrb[8].mxu1 %v1237_v22 }
  0x9d   : > { %500 = vmatprep.mubr.bf16.mxu0 %v1440_v0  ;;  %540 = vmatprep.mubr.bf16.mxu1 %v1440_v0 }
  0xa4   : > { %501 = vmatmul.mubr.bf16.gmra.mrb[12].mxu0 %v1238_v23  ;;  %541 = vmatmul.mubr.bf16.gmra.mrb[12].mxu1 %v1239_v24 }
 0x15f   : > { %v472_v31 = vpop.f32.mrb[0].mxu0  ;;  %v512_v32 = vpop.f32.mrb[0].mxu1 }
 0x160   : > { %v474_v34 = vpop.f32.mrb[1].mxu0  ;;  %v514_v35 = vpop.f32.mrb[1].mxu1  ;;  %v473_v38 = vadd.f32 %v472_v31, %v1676_v30  ;;  %v513_v39 = vadd.f32 %v512_v32, %v1676_v30 }
 0x161   : > { %v476_v36 = vpop.f32.mrb[2].mxu0  ;;  %v516_v37 = vpop.f32.mrb[2].mxu1  ;;  %v475_v44 = vadd.f32 %v474_v34, %v1678_v33  ;;  %v515_v45 = vadd.f32 %v514_v35, %v1678_v33 }
 0x162   : > { %v477_v40 = vadd.f32 %v476_v36, %v1676_v30  ;;  %v517_v41 = vadd.f32 %v516_v37, %v1676_v30  ;;  %v478_v42 = vpop.f32.mrb[3].mxu0  ;;  %v518_v43 = vpop.f32.mrb[3].mxu1 }
 0x163   : > { %v479_v46 = vadd.f32 %v478_v42, %v1678_v33  ;;  %v519_v47 = vadd.f32 %v518_v43, %v1678_v33 }
 0x164   : > { %v1000_v48 = vpack.c.bf16 %v477_v40, %v473_v38  ;;  %v1020_v49 = vpack.c.bf16 %v517_v41, %v513_v39 }
 0x165   : > { %v1040_v50 = vpack.c.bf16 %v479_v46, %v475_v44  ;;  %v1060_v51 = vpack.c.bf16 %v519_v47, %v515_v45 }
 0x166   : > { %1001 = vst [vmem:[%s1689_s27] sm:$0xff] %v1000_v48   ;;  %1080 = vst [vmem:[%s1689_s27 + $0x20] sm:$0xff] %v1020_v49  }
 0x167   : > { %1041 = vst [vmem:[%s1694_s29] sm:$0xff] %v1040_v50   ;;  %1087 = vst [vmem:[%s1694_s29 + $0x20] sm:$0xff] %v1060_v51   ;;  %v482_v52 = vpop.f32.mrb[4].mxu0  ;;  %v522_v53 = vpop.f32.mrb[4].mxu1 }
 0x168   : > { %v484_v54 = vpop.f32.mrb[5].mxu0  ;;  %v524_v55 = vpop.f32.mrb[5].mxu1  ;;  %v483_v58 = vadd.f32 %v482_v52, %v1676_v30  ;;  %v523_v59 = vadd.f32 %v522_v53, %v1676_v30 }
 0x169   : > { %v486_v56 = vpop.f32.mrb[6].mxu0  ;;  %v526_v57 = vpop.f32.mrb[6].mxu1  ;;  %v485_v0 = vadd.f32 %v484_v54, %v1678_v33  ;;  %v525_v1 = vadd.f32 %v524_v55, %v1678_v33 }
 0x16a   : > { %v487_v60 = vadd.f32 %v486_v56, %v1676_v30  ;;  %v527_v61 = vadd.f32 %v526_v57, %v1676_v30  ;;  %v488_v62 = vpop.f32.mrb[7].mxu0  ;;  %v528_v63 = vpop.f32.mrb[7].mxu1 }
 0x16b   : > { %v489_v2 = vadd.f32 %v488_v62, %v1678_v33  ;;  %v529_v3 = vadd.f32 %v528_v63, %v1678_v33 }
 0x16c   : > { %v1005_v4 = vpack.c.bf16 %v487_v60, %v483_v58  ;;  %v1025_v5 = vpack.c.bf16 %v527_v61, %v523_v59 }
 0x16d   : > { %v1045_v6 = vpack.c.bf16 %v489_v2, %v485_v0  ;;  %v1065_v7 = vpack.c.bf16 %v529_v3, %v525_v1 }
 0x16e   : > { %1077 = vst [vmem:[%s1689_s27 + $0x8] sm:$0xff] %v1005_v4   ;;  %1081 = vst [vmem:[%s1689_s27 + $0x28] sm:$0xff] %v1025_v5  }
 0x16f   : > { %1084 = vst [vmem:[%s1694_s29 + $0x8] sm:$0xff] %v1045_v6   ;;  %1088 = vst [vmem:[%s1694_s29 + $0x28] sm:$0xff] %v1065_v7   ;;  %v492_v8 = vpop.f32.mrb[8].mxu0  ;;  %v532_v9 = vpop.f32.mrb[8].mxu1 }
 0x170   : > { %v494_v10 = vpop.f32.mrb[9].mxu0  ;;  %v534_v11 = vpop.f32.mrb[9].mxu1  ;;  %v493_v14 = vadd.f32 %v492_v8, %v1676_v30  ;;  %v533_v15 = vadd.f32 %v532_v9, %v1676_v30 }
 0x171   : > { %v496_v12 = vpop.f32.mrb[10].mxu0  ;;  %v536_v13 = vpop.f32.mrb[10].mxu1  ;;  %v495_v20 = vadd.f32 %v494_v10, %v1678_v33  ;;  %v535_v21 = vadd.f32 %v534_v11, %v1678_v33 }
 0x172   : > { %v497_v16 = vadd.f32 %v496_v12, %v1676_v30  ;;  %v537_v17 = vadd.f32 %v536_v13, %v1676_v30  ;;  %v498_v18 = vpop.f32.mrb[11].mxu0  ;;  %v538_v19 = vpop.f32.mrb[11].mxu1 }
 0x173   : > { %v499_v22 = vadd.f32 %v498_v18, %v1678_v33  ;;  %v539_v23 = vadd.f32 %v538_v19, %v1678_v33 }
 0x174   : > { %v1010_v24 = vpack.c.bf16 %v497_v16, %v493_v14  ;;  %v1030_v25 = vpack.c.bf16 %v537_v17, %v533_v15 }
 0x175   : > { %v1050_v26 = vpack.c.bf16 %v499_v22, %v495_v20  ;;  %v1070_v27 = vpack.c.bf16 %v539_v23, %v535_v21 }
 0x176   : > { %1078 = vst [vmem:[%s1689_s27 + $0x10] sm:$0xff] %v1010_v24   ;;  %1082 = vst [vmem:[%s1689_s27 + $0x30] sm:$0xff] %v1030_v25  }
 0x177   : > { %1085 = vst [vmem:[%s1694_s29 + $0x10] sm:$0xff] %v1050_v26   ;;  %1089 = vst [vmem:[%s1694_s29 + $0x30] sm:$0xff] %v1070_v27   ;;  %v502_v28 = vpop.f32.mrb[12].mxu0  ;;  %v542_v29 = vpop.f32.mrb[12].mxu1 }
 0x178   : > { %v504_v31 = vpop.f32.mrb[13].mxu0  ;;  %v544_v32 = vpop.f32.mrb[13].mxu1  ;;  %v503_v36 = vadd.f32 %v502_v28, %v1676_v30  ;;  %v543_v37 = vadd.f32 %v542_v29, %v1676_v30 }
 0x179   : > { %v506_v34 = vpop.f32.mrb[14].mxu0  ;;  %v546_v35 = vpop.f32.mrb[14].mxu1  ;;  %v505_v42 = vadd.f32 %v504_v31, %v1678_v33  ;;  %v545_v43 = vadd.f32 %v544_v32, %v1678_v33 }
 0x17a   : > { %v507_v38 = vadd.f32 %v506_v34, %v1676_v30  ;;  %v547_v39 = vadd.f32 %v546_v35, %v1676_v30  ;;  %v508_v40 = vpop.f32.mrb[15].mxu0  ;;  %v548_v41 = vpop.f32.mrb[15].mxu1 }
 0x17b   : > { %v509_v44 = vadd.f32 %v508_v40, %v1678_v33  ;;  %v549_v45 = vadd.f32 %v548_v41, %v1678_v33 }
 0x17c   : > { %v1015_v30 = vpack.c.bf16 %v507_v38, %v503_v36  ;;  %v1035_v46 = vpack.c.bf16 %v547_v39, %v543_v37 }
 0x17d   : > { %v1055_v47 = vpack.c.bf16 %v509_v44, %v505_v42  ;;  %v1075_v48 = vpack.c.bf16 %v549_v45, %v545_v43 }
 0x17e   : > { %1079 = vst [vmem:[%s1689_s27 + $0x18] sm:$0xff] %v1015_v30   ;;  %1083 = vst [vmem:[%s1689_s27 + $0x38] sm:$0xff] %v1035_v46  }
 0x17f   : > { %1086 = vst [vmem:[%s1694_s29 + $0x18] sm:$0xff] %v1055_v47   ;;  %1090 = vst [vmem:[%s1694_s29 + $0x38] sm:$0xff] %v1075_v48  }
 0x180   : > { %1311 = shalt.err (!%p1308_p7)
}
 0x181   : > { %s1312_s25 = scalar_lea.hbm %s1744_s14, 1024  ;;  %s1316_s7 = scalar_lea.hbm %s1840_s3, 4096 }
 0x182   : > { %p1313_p1 = scmp.ne.s32.totalorder %s1744_s14, %s1312_s25  ;;  %p1317_p5 = scmp.lt.u32.totalorder %s1744_s14, %s1840_s3 }
 0x183   : > { %p1318_p9 = scmp.lt.u32.totalorder %s1316_s7, %s1312_s25  ;;  %p1320_p6 = scmp.lt.u32.totalorder %s1312_s25, %s1744_s14 }
 0x184   : > { %p1314_p2 = pnand %p1313_p1, %p1575_p11 }
 0x185   : > { %p1319_p0 = por %p1318_p9, %p1317_p5 }
 0x186   : > { %p1315_p4 = pneg %p1314_p2 }
 0x187   : > { %p1321_p8 = por %p1320_p6, %p1319_p0 }
 0x189   : > { %p1322_p10 = pnand %p1321_p8, %p1315_p4 }
 0x18b   : > { %1325 = shalt.err (!%p1322_p10)
}
 0x18c   : > { %s1442_s19 = smov 64   ;;  %s1443_s13 = smov 4  }
 0x18d   : > { %1113 = dma.vmem_to_hbm [thread:$0]  (%p1575_p11), %s1729_s18, 1024, %s1744_s14, %s712_s30, %s1442_s19, %s1442_s19, %s1443_s13  }
 0x18e   : > { %s717_s12 = scalar_lea.sflag [#allocation9], %s1640_s8  ;;  %s1326_s23 = scalar_lea.vmem %s1731_s28, 1024 }
 0x18f   : > { %p1327_p12 = scmp.ne.s32.totalorder %s1731_s28, %s1326_s23  ;;  %s1444_s24 = smov [#allocation8]  }
 0x190   : > { %s1330_s5 = sshll.u32 %s1444_s24, 4  ;;  %s1331_s5 = int_to_ptr.vmem [resolvable:$false] %s1330_s5 }
 0x191   : > { %p1328_p13 = pnand %p1327_p12, %p1575_p11  ;;  %s1332_s20 = scalar_lea.vmem %s1331_s5, 2048 }
 0x192   : > { %p1333_p7 = scmp.lt.s32.totalorder %s1731_s28, %s1331_s5  ;;  %p1334_p1 = scmp.lt.s32.totalorder %s1332_s20, %s1326_s23 }
 0x193   : > { %p1329_p3 = pneg %p1328_p13 }
 0x194   : > { %p1335_p2 = por %p1334_p1, %p1333_p7 }
 0x196   : > { %p1336_p4 = pnand %p1335_p2, %p1329_p3 }
 0x198   : > { %1339 = shalt.err (!%p1336_p4)
}
 0x199   : > { %s1340_s18 = scalar_lea.hbm %s1749_s26, 1024  ;;  %s1344_s9 = scalar_lea.hbm %s1841_s4, 4096 }
 0x19a   : > { %p1341_p5 = scmp.ne.s32.totalorder %s1749_s26, %s1340_s18  ;;  %p1345_p6 = scmp.lt.u32.totalorder %s1749_s26, %s1841_s4 }
 0x19b   : > { %p1346_p8 = scmp.lt.u32.totalorder %s1344_s9, %s1340_s18  ;;  %p1348_p12 = scmp.lt.u32.totalorder %s1340_s18, %s1749_s26 }
 0x19c   : > { %p1342_p9 = pnand %p1341_p5, %p1575_p11 }
 0x19d   : > { %p1347_p10 = por %p1346_p8, %p1345_p6 }
 0x19e   : > { %p1343_p0 = pneg %p1342_p9 }
 0x19f   : > { %p1349_p13 = por %p1348_p12, %p1347_p10 }
 0x1a1   : > { %p1350_p3 = pnand %p1349_p13, %p1343_p0 }
 0x1a3   : > { %1353 = shalt.err (!%p1350_p3)
}
 0x1a4   : > { %1114 = dma.vmem_to_hbm [thread:$0]  (%p1575_p11), %s1731_s28, 1024, %s1749_s26, %s717_s12, %s1442_s19, %s1442_s19, %s1443_s13  }
 0x1a5 PF: > { %s1871_s27 = sld [smem:[#allocation14_spill]]  ;;  %s1872_s29 = sld [smem:[#allocation16_spill]] }
 0x1a6   : > { %p1135_p7 = scmp.ge.s32.totalorder %s1432_s22, 2 }
 0x1ab   : > { %s765_s7 = sand.u32 1, %s1871_s27   ;;  %p1873_p1 = scmp.ne.s32.totalorder %s1872_s29, 0 }
 0x1ac   : > { %s766_s11 = scalar_lea.sflag [#allocation4], %s765_s7 }
 0x1ad   : > { %p1126_p2 = pnand %p1135_p7, %p1873_p1 }
 0x1af   : > { %1395 = dma.done.wait (!%p1126_p2), %s766_s11, 1024  }
 0x1b0   : > { %1397 = vsyncadd (!%p1126_p2), %s766_s11, 4294966272  ;;  %s775_s6 = scalar_lea.sflag [#allocation9], %s765_s7 }
 0x1b1   : > { %1399 = dma.done.wait (!%p1126_p2), %s775_s6, 1024  }
 0x1b2   : > { %1401 = vsyncadd (!%p1126_p2), %s775_s6, 4294966272  ;;  %s25_s22 = sadd.s32 1, %s1432_s22   ;;  %s1874_s18 = sld [smem:[#allocation15_spill]] }
 0x1b3   : > { %p22_p4 = scmp.ge.s32.totalorder %s25_s22, 6   ;;  %s1875_s20 = sld [smem:[#allocation17_spill]] }
 0x1b4   : > { %s1876_s8 = sld [smem:[#allocation18_spill]]  ;;  %s1877_s15 = smov %s1408_s16 }
 0x1b5   : > { %s1878_s16 = smov %s1412_s17  ;;  %s1879_s17 = smov %s1592_s1 }
 0x1b6   : > { %s1880_s19 = smov %s1428_s21  ;;  %24 = sbr.rel (!%p22_p4) target bundleno = 12 (0xc), region = 98 }
 0x1ba   : > { %s1881_s21 = smov %s1876_s8 }
 0x1bd   :  { %780 = vsyncpa [#allocation3], 1 }
 0x1be   :  { %782 = vsyncpa [#allocation3 + $0x1], 1 }
 0x1bf   :  { %783 = vsyncpa [#allocation6], 1 }
 0x1c0   :  { %784 = vsyncpa [#allocation4], 1 }
 0x1c1   :  { %786 = vsyncpa [#allocation4 + $0x1], 1 }
 0x1c2   :  { %787 = vsyncpa [#allocation9], 1 }
 0x1c3   :  { %789 = vsyncpa [#allocation9 + $0x1], 1 }

</bundles_post_ra>
